<compile_context>
chip_gen: v5e
topology: v5e:2x2
jax: 0.10.0
libtpu: 0.0.40
codegen_flags: <defaults>
</compile_context>

<pallas_src>
import math

import jax
import jax.numpy as jnp
from jax.experimental import pallas as pl
from jax.experimental.pallas import tpu as pltpu

IN_FEATURES = 39 * 6          # 234, fixed by the module definition
NODE_FEAT = IN_FEATURES // 2  # 117 per node (cat of src+dst -> 234)


def _node_projection_kernel(h_ref, w_ref, b_ref, o_ref):
    # h_ref: [tile_n, 117]   w_ref: [117, 2C]   b_ref: [1, 2C]   o_ref: [tile_n, 2C]
    acc = jnp.dot(h_ref[...], w_ref[...], preferred_element_type=jnp.float32)
    o_ref[...] = (acc + b_ref[...]).astype(o_ref.dtype)


def mlp_predictor_scores(h, src, dst, weight, bias, *, tile_n=None):
    """Pallas implementation of MLPPredictor.forward.

    h:      [N, NODE_FEAT] float32 node features
    src:    [E] int32 source node ids
    dst:    [E] int32 destination node ids
    weight: [out_classes, IN_FEATURES]  (PyTorch nn.Linear layout)
    bias:   [out_classes]
    returns: [E, out_classes]
    """
    N, feat = h.shape
    assert feat == NODE_FEAT, f"expected node feature dim {NODE_FEAT}, got {feat}"
    C = weight.shape[0]

    # Split the Linear over the concat:  W @ [h_u; h_v] + b = W_src @ h_u + b + W_dst @ h_v.
    # Pack both halves side-by-side so one matmul produces both projections; fold the
    # bias into the src half so the whole learnable layer lives inside the kernel.
    w_node = jnp.concatenate(
        [weight[:, :NODE_FEAT].T, weight[:, NODE_FEAT:].T], axis=1)      # [117, 2C]
    b_node = jnp.concatenate([bias, jnp.zeros_like(bias)]).reshape(1, 2 * C)

    # Large row tiles (review item 1): per-step overhead is ~0.35us, so stream up to
    # 1024 rows per grid step.  1024 x 117 x 4B ~= 0.45 MB per buffer (double-buffered
    # < 1 MB), comfortably inside the default scoped-VMEM limit on v5e/v6e/v7x, so no
    # vmem_limit_bytes override is needed.  No explicit padding of h (review item 5):
    # Pallas handles an uneven last block; rows >= N are garbage but never gathered.
    if tile_n is None:
        tile_n = N if N <= 1024 else 1024

    p = pl.pallas_call(
        _node_projection_kernel,
        out_shape=jax.ShapeDtypeStruct((N, 2 * C), h.dtype),
        grid=(pl.cdiv(N, tile_n),),
        in_specs=[
            pl.BlockSpec((tile_n, NODE_FEAT), lambda i: (i, 0)),
            pl.BlockSpec((NODE_FEAT, 2 * C), lambda i: (0, 0)),   # weight: VMEM-resident
            pl.BlockSpec((1, 2 * C), lambda i: (0, 0)),           # bias:   VMEM-resident
        ],
        out_specs=pl.BlockSpec((tile_n, 2 * C), lambda i: (i, 0)),
        compiler_params=pltpu.CompilerParams(
            dimension_semantics=("parallel",),   # lets v7x shard the row grid over 2 TCs
        ),
    )(h, w_node, b_node)

    # Per-edge combine (graph.apply_edges equivalent).  Bias is already folded into the
    # src half, so this is exactly W @ cat([h_u, h_v]) + b.
    # TODO(synk): the data-dependent per-edge gather stays in XLA — it is already at the
    # minimum possible HBM traffic (read 2*E*C + write E*C floats); an in-kernel dynamic
    # gather (scalar-prefetched src/dst + VMEM-resident p) could fuse it further.
    scores = p[src, :C] + p[dst, C:]
    return scores


def init_linear_params(key, in_features, out_features, dtype=jnp.float32):
    """Deterministic init matching torch.nn.Linear's default (uniform +/- 1/sqrt(fan_in))."""
    kw, kb = jax.random.split(key)
    bound = 1.0 / math.sqrt(in_features)
    weight = jax.random.uniform(kw, (out_features, in_features), dtype,
                                minval=-bound, maxval=bound)
    bias = jax.random.uniform(kb, (out_features,), dtype,
                              minval=-bound, maxval=bound)
    return weight, bias


if __name__ == "__main__":
    key = jax.random.PRNGKey(0)
    k_h, k_src, k_dst, k_w = jax.random.split(key, 4)

    num_nodes = 10
    num_edges = 16
    out_classes = 8

    h = jax.random.normal(k_h, (num_nodes, NODE_FEAT), dtype=jnp.float32)
    src = jax.random.randint(k_src, (num_edges,), 0, num_nodes, dtype=jnp.int32)
    dst = jax.random.randint(k_dst, (num_edges,), 0, num_nodes, dtype=jnp.int32)

    weight, bias = init_linear_params(k_w, IN_FEATURES, out_classes)

    scores = mlp_predictor_scores(h, src, dst, weight, bias)
    scores = jax.block_until_ready(scores)

    # Reference check (pure JAX, original edge-major formulation).
    ref = jnp.concatenate([h[src], h[dst]], axis=1) @ weight.T + bias
    assert scores.shape == (num_edges, out_classes)
    assert jnp.allclose(scores, ref, atol=1e-4, rtol=1e-4), "mismatch vs reference"

    print("KERNEL_OK")
</pallas_src>

<mosaic_0001>
module attributes {stable_mosaic.version = 11 : i64} {
  func.func @_node_projection_kernel(%arg0: i32, %arg1: memref<10x117xf32, #tpu.memory_space<vmem>>, %arg2: memref<117x16xf32, #tpu.memory_space<vmem>>, %arg3: memref<1x16xf32, #tpu.memory_space<vmem>>, %arg4: memref<10x16xf32, #tpu.memory_space<vmem>>) attributes {dimension_semantics = [#tpu.dimension_semantics<parallel>], iteration_bounds = array<i64: 1>, scalar_prefetch = 0 : i64, scratch_operands = 0 : i64, tpu.core_type = #tpu.core_type<tc>, window_params = [{transform_indices = @transform_0, window_bounds = array<i64: 10, 117>}, {pipeline_mode = #tpu.pipeline_mode<synchronous>, transform_indices = @transform_1, window_bounds = array<i64: 117, 16>}, {pipeline_mode = #tpu.pipeline_mode<synchronous>, transform_indices = @transform_2, window_bounds = array<i64: 1, 16>}, {transform_indices = @transform_3, window_bounds = array<i64: 10, 16>}]} {
    %c0 = arith.constant 0 : index
    %c0_0 = arith.constant 0 : index
    %0 = vector.load %arg1[%c0, %c0_0] : memref<10x117xf32, #tpu.memory_space<vmem>>, vector<10x117xf32>
    %c0_1 = arith.constant 0 : index
    %c0_2 = arith.constant 0 : index
    %1 = vector.load %arg2[%c0_1, %c0_2] : memref<117x16xf32, #tpu.memory_space<vmem>>, vector<117x16xf32>
    %cst = arith.constant dense<0.000000e+00> : vector<10x16xf32>
    %2 = tpu.matmul %0, %1, %cst {dimension_numbers = #tpu.dot_dimension_numbers<[1], [0], [0], [1], [0, 0, 1, 1], [], []>} : vector<10x117xf32>, vector<117x16xf32>, vector<10x16xf32> -> vector<10x16xf32>
    %c0_3 = arith.constant 0 : index
    %c0_4 = arith.constant 0 : index
    %3 = vector.load %arg3[%c0_3, %c0_4] : memref<1x16xf32, #tpu.memory_space<vmem>>, vector<1x16xf32>
    %4 = vector.broadcast %3 : vector<1x16xf32> to vector<10x16xf32>
    %5 = arith.addf %2, %4 : vector<10x16xf32>
    %c0_5 = arith.constant 0 : index
    %c0_6 = arith.constant 0 : index
    %6 = vector.load %arg4[%c0_5, %c0_6] : memref<10x16xf32, #tpu.memory_space<vmem>>, vector<10x16xf32>
    tpu.vector_store %arg4[%c0_5, %c0_6], %5 {strides = array<i32>} : memref<10x16xf32, #tpu.memory_space<vmem>>, vector<10x16xf32>,
    return
  }
  func.func @transform_0(%arg0: i32) -> (i32, i32) {
    %c0_i32 = arith.constant 0 : i32
    %c0_i32_0 = arith.constant 0 : i32
    return %arg0, %c0_i32 : i32, i32
  }
  func.func @transform_1(%arg0: i32) -> (i32, i32) {
    %c0_i32 = arith.constant 0 : i32
    %c0_i32_0 = arith.constant 0 : i32
    %c0_i32_1 = arith.constant 0 : i32
    return %c0_i32, %c0_i32_0 : i32, i32
  }
  func.func @transform_2(%arg0: i32) -> (i32, i32) {
    %c0_i32 = arith.constant 0 : i32
    %c0_i32_0 = arith.constant 0 : i32
    %c0_i32_1 = arith.constant 0 : i32
    return %c0_i32, %c0_i32_0 : i32, i32
  }
  func.func @transform_3(%arg0: i32) -> (i32, i32) {
    %c0_i32 = arith.constant 0 : i32
    %c0_i32_0 = arith.constant 0 : i32
    return %arg0, %c0_i32 : i32, i32
  }
}

</mosaic_0001>

<bundles_post_ra>
// kernel: tpu_custom_call.1
= control target key start
LH: loop header
LB: loop body
LE: loop exit
PB: predicated region body
PF: predicated region fallthrough
CT: control target
= control target key end

     0   :  { %vm43_vm0 = vcmask 1044480   ;;  %s220_s0 = inlined_call_operand.vmem [shape: f32[10,117], index: 0, kind: input, shape index: {}]   ;;  %s221_s1 = inlined_call_operand.vmem [shape: f32[117,16], index: 1, kind: input, shape index: {}]   ;;  %s222_s2 = inlined_call_operand.vmem [shape: f32[1,16], index: 2, kind: input, shape index: {}]   ;;  %s223_s3 = inlined_call_operand.hbm [shape: f32[10,16], index: 3, kind: output, shape index: {}]  }
   0x1   :  { %v31_v0 = vld [vmem:[%s221_s1 + $0x70] sm:$0x1f]  ;;  %v30_v1 = vld [vmem:[%s221_s1 + $0x68] sm:$0xff]  ;;  %v29_v2 = vld [vmem:[%s221_s1 + $0x60] sm:$0xff] }
   0x2   :  { %92 = vmatpush.msk.msra.mxu0 %vm43_vm0, %v31_v0  ;;  %95 = vmatpush.msk.msra.mxu1 %vm43_vm0, %v31_v0  ;;  %v28_v3 = vld [vmem:[%s221_s1 + $0x58] sm:$0xff]  ;;  %v27_v4 = vld [vmem:[%s221_s1 + $0x50] sm:$0xff] }
   0x4   :  { %49 = vmatpush.msra.mxu0 %v30_v1  ;;  %96 = vmatpush.msra.mxu1 %v30_v1 }
   0x6   :  { %50 = vmatpush.msra.mxu0 %v29_v2  ;;  %97 = vmatpush.msra.mxu1 %v29_v2 }
   0x7   :  { %8 = vsyncpa [#allocation3], 0  ;;  %v26_v5 = vld [vmem:[%s221_s1 + $0x48] sm:$0xff]  ;;  %v25_v6 = vld [vmem:[%s221_s1 + $0x40] sm:$0xff]  ;;  %vm36_vm1 = vcmask 957440   ;;  %s80_s24 = sshll.u32 %s223_s3, 4  ;;  %s81_s24 = int_to_ptr.hbm [resolvable:$true] %s80_s24 }
   0x8   :  { %51 = vmatpush.msra.mxu0 %v28_v3  ;;  %98 = vmatpush.msra.mxu1 %v28_v3  ;;  %v24_v7 = vld [vmem:[%s221_s1 + $0x38] sm:$0xff]  ;;  %v23_v8 = vld [vmem:[%s221_s1 + $0x30] sm:$0xff]  ;;  %v22_v9 = vld [vmem:[%s221_s1 + $0x28] sm:$0xff]  ;;  %vm70_vm2 = vcmask 130048   ;;  %vm72_vm3 = vcmask 123904   ;;  %s142_s25 = smov 8  }
   0x9   :  { %v21_v10 = vld [vmem:[%s221_s1 + $0x20] sm:$0xff]  ;;  %v20_v11 = vld [vmem:[%s221_s1 + $0x18] sm:$0xff]  ;;  %v19_v12 = vld [vmem:[%s221_s1 + $0x10] sm:$0xff] }
   0xa   :  { %52 = vmatpush.msra.mxu0 %v27_v4  ;;  %99 = vmatpush.msra.mxu1 %v27_v4  ;;  %v18_v13 = vld [vmem:[%s221_s1 + $0x8] sm:$0xff]  ;;  %v17_v14 = vld [vmem:[%s221_s1] sm:$0xff]  ;;  %s140_s1 = smov [#allocation2]  }
   0xb   :  { %v15_v15 = vld [vmem:[%s220_s0] sm:$0xff]  ;;  %v16_v16 = vld [vmem:[%s220_s0 + $0x8] sm:$0x3]  ;;  %s78_s21 = sshll.u32 %s140_s1, 4  ;;  %s141_s0 = smov 128   ;;  %s79_s21 = int_to_ptr.vmem [resolvable:$true] %s78_s21 }
   0xc   :  { %53 = vmatpush.msra.mxu0 %v26_v5  ;;  %100 = vmatpush.msra.mxu1 %v26_v5  ;;  %v113_v17 = vld [vmem:[%s222_s2] ss:$0 sm:$0xff] }
   0xe   :  { %54 = vmatpush.msra.mxu0 %v25_v6  ;;  %101 = vmatpush.msra.mxu1 %v25_v6 }
  0x10   :  { %55 = vmatpush.msra.mxu0 %v24_v7  ;;  %102 = vmatpush.msra.mxu1 %v24_v7 }
  0x12   :  { %56 = vmatpush.msra.mxu0 %v23_v8  ;;  %103 = vmatpush.msra.mxu1 %v23_v8 }
  0x14   :  { %57 = vmatpush.msra.mxu0 %v22_v9  ;;  %104 = vmatpush.msra.mxu1 %v22_v9 }
  0x16   :  { %58 = vmatpush.msra.mxu0 %v21_v10  ;;  %105 = vmatpush.msra.mxu1 %v21_v10 }
  0x18   :  { %59 = vmatpush.msra.mxu0 %v20_v11  ;;  %106 = vmatpush.msra.mxu1 %v20_v11 }
  0x1a   :  { %60 = vmatpush.msra.mxu0 %v19_v12  ;;  %107 = vmatpush.msra.mxu1 %v19_v12 }
  0x1c   :  { %61 = vmatpush.msra.mxu0 %v18_v13  ;;  %108 = vmatpush.msra.mxu1 %v18_v13 }
  0x1e   :  { %62 = vmatpush.msra.mxu0 %v17_v14  ;;  %109 = vmatpush.msra.mxu1 %v17_v14 }
  0x1f   :  { %93 = vmatmul.msk.f32.vlgmr.msra.gmra.mxu0 %vm36_vm1, %v15_v15  ;;  %94 = vmatmul.msk.f32.vlgmr.msra.gmra.mxu1 %vm36_vm1, %v16_v16 }
  0x9c   :  { %v64_v18 = vpop.f32.mrf.mxu0  ;;  %v67_v19 = vpop.f32.mrf.mxu1 }
  0x9d   :  { %v65_v20 = vadd.f32 %v113_v17, %v64_v18  ;;  %v68_v21 = vadd.f32 %v113_v17, %v67_v19 }
  0x9f   :  { %71 = vst.msk [vmem:[#allocation2] sm:$0xff] %vm70_vm2, %v65_v20 }
  0xa0   :  { %73 = vst.msk [vmem:[#allocation2 + $0x8] sm:$0x3] %vm72_vm3, %v68_v21 }
  0xa1   :  { %86 = dma.vmem_to_hbm [thread:$0]  %s79_s21, 256, %s81_s24, [#allocation3], %s141_s0, %s141_s0, %s142_s25  }
  0xa2   :  { %138 = dma.done.wait [#allocation3], 256  }
  0xa3   :  { %139 = vsyncadd [#allocation3], 4294967040 }
  0xa4   :  { %91 = vsyncpa [#allocation3], 1 }

</bundles_post_ra>
